<compile_context>
chip_gen: v7x
topology: tpu7x:2x2x1
jax: 0.10.0
libtpu: 0.0.40
codegen_flags: <defaults>
</compile_context>

<pallas_src>
import numpy as np
import jax
import jax.numpy as jnp
from jax import lax
from jax.experimental import pallas as pl
from jax.experimental.pallas import tpu as pltpu


def patch_len(n, epochs):
    """Split n steps into `epochs` patches (first patches get the remainder)."""
    list_len = []
    base = n // epochs
    for _ in range(epochs):
        list_len.append(base)
    for i in range(n - base * epochs):
        list_len[i] += 1
    assert sum(list_len) == n, "check your epochs and axis should be split again"
    return list_len


def _make_e2r_kernel(starts, lens, C, bb, eps=1e-5):
    """Build a kernel with the (static) epoch schedule and batch block baked in."""
    epochs = len(lens)

    def kernel(x_ref, out_ref):
        x = x_ref[...].astype(jnp.float32)                 # (bb, C, T)
        T = x.shape[-1]

        # Constants, built once per body (hoisted out of all loops).
        t_idx = lax.broadcasted_iota(jnp.int32, (1, 1, T), 2)
        row = lax.broadcasted_iota(jnp.int32, (C, C), 0)
        col = lax.broadcasted_iota(jnp.int32, (C, C), 1)
        eye = (row == col).astype(jnp.float32)             # (C, C) identity

        # Centre + window-mask every epoch patch (vectorised over the batch
        # block); zeros outside each window make the Gram block-diagonal
        # across epochs.
        per_epoch = []
        for p in range(epochs):                            # epochs small & static
            s, ln = starts[p], lens[p]
            mask = ((t_idx >= s) & (t_idx < s + ln)).astype(jnp.float32)  # (1,1,T)
            xm = x * mask                                                  # (bb,C,T)
            mean = jnp.sum(xm, axis=-1, keepdims=True) * (1.0 / ln)        # (bb,C,1)
            per_epoch.append((x - mean) * mask)                            # (bb,C,T)

        # Stack rows batch-major / epoch-minor: group k = b*epochs + p.
        rows = [per_epoch[p][b] for b in range(bb) for p in range(epochs)]
        xs = jnp.concatenate(rows, axis=0)                 # (bb*epochs*C, T)

        # One block-diagonal Gram matmul on the MXU (f32 accumulation) instead
        # of bb*epochs tiny pushes.
        g = lax.dot_general(xs, xs, (((1,), (1,)), ((), ())),
                            preferred_element_type=jnp.float32)  # (R, R)

        # Read back the diagonal (C, C) blocks and normalise them.
        out_rows = []
        for b in range(bb):
            covs = []
            for p in range(epochs):
                k = b * epochs + p
                blk = g[k * C:(k + 1) * C, k * C:(k + 1) * C]      # (C, C)
                cov = blk * (1.0 / (lens[p] - 1))
                tra = jnp.sum(cov * eye)                           # trace (exact div
                covs.append(cov / tra + eps * eye)                 #  keeps 1e-5 tol)
            out_rows.append(jnp.concatenate(covs, axis=0)[None])   # (1, epochs*C, C)

        out = jnp.concatenate(out_rows, axis=0)                    # (bb, epochs*C, C)
        out_ref[...] = out.astype(out_ref.dtype)

    return kernel


def e2r_forward(x, epochs):
    """Pallas implementation of the E2R stage.  x: (B, C, T) -> (B, epochs, C, C)."""
    B, C, T = x.shape
    epochs = int(epochs)
    lens = patch_len(T, epochs)
    # Guard the (n - 1) and trace divisions against degenerate patch sizes.
    assert min(lens) >= 2, "each epoch patch needs >= 2 samples for the covariance"

    starts = [0]
    for ln in lens[:-1]:
        starts.append(starts[-1] + ln)

    # Batch block size: aim for ~256 stacked rows per MXU push, but keep the
    # grid at >= 2 steps so v7x's second TensorCore is not idle.
    rows_per_batch = epochs * C
    bb = max(1, 256 // rows_per_batch)
    if B >= 2:
        bb = min(bb, (B + 1) // 2)
    bb = max(1, min(bb, B))

    pad = (-B) % bb
    if pad:
        # Replicate the first element so padded groups stay finite (their
        # results are sliced away below).
        x_in = jnp.concatenate([x, jnp.broadcast_to(x[:1], (pad, C, T))], axis=0)
    else:
        x_in = x
    Bp = B + pad

    kernel = _make_e2r_kernel(tuple(starts), tuple(lens), C, bb)

    out = pl.pallas_call(
        kernel,
        out_shape=jax.ShapeDtypeStruct((Bp, epochs * C, C), x.dtype),
        grid=(Bp // bb,),                                   # batch-blocked grid
        in_specs=[pl.BlockSpec((bb, C, T), lambda i: (i, 0, 0))],
        out_specs=pl.BlockSpec((bb, epochs * C, C), lambda i: (i, 0, 0)),
        compiler_params=pltpu.CompilerParams(
            dimension_semantics=("parallel",)),             # megacore-shard batch (v7x)
    )(x_in)

    if pad:
        out = out[:B]
    # Metadata-only reshape: (B, epochs*C, C) -> (B, epochs, C, C); matches
    # torch.stack(x_list).permute(1, 0, 2, 3) with no extra XLA transpose op.
    return out.reshape(B, epochs, C, C)


def e2r_reference(x, epochs):
    """Pure-JAX reference mirroring the PyTorch module step-by-step."""
    B, C, T = x.shape
    lens = patch_len(T, int(epochs))
    outs, start = [], 0
    for ln in lens:
        xp = x[:, :, start:start + ln]
        start += ln
        mean = xp.mean(axis=-1, keepdims=True)
        xc = xp - mean
        cov = xc @ jnp.swapaxes(xc, 1, 2)
        cov = cov / (ln - 1)
        tra = jnp.trace(cov, axis1=-2, axis2=-1).reshape(-1, 1, 1)
        cov = cov / tra
        cov = cov + 1e-5 * jnp.eye(C, dtype=x.dtype)
        outs.append(cov)
    return jnp.stack(outs, axis=1)


if __name__ == "__main__":
    # Small, module-consistent shapes: batch=2, channels=8, time=18, epochs=4
    # -> patch lengths [5, 5, 4, 4] (non-uniform split exercised).
    B, C, T = 2, 8, 18
    epochs = 4

    key = jax.random.PRNGKey(0)
    x = jax.random.normal(key, (B, C, T), dtype=jnp.float32)

    out = e2r_forward(x, epochs)
    out = jax.block_until_ready(out)

    ref = e2r_reference(x, epochs)
    assert out.shape == (B, epochs, C, C), out.shape
    np.testing.assert_allclose(np.asarray(out), np.asarray(ref), rtol=1e-5, atol=1e-5)

    print("KERNEL_OK")
</pallas_src>

<mosaic_0001>
module attributes {stable_mosaic.version = 11 : i64} {
  func.func @kernel(%arg0: i32, %arg1: memref<1x8x18xf32, #tpu.memory_space<vmem>>, %arg2: memref<1x32x8xf32, #tpu.memory_space<vmem>>) attributes {dimension_semantics = [#tpu.dimension_semantics<parallel>], iteration_bounds = array<i64: 2>, scalar_prefetch = 0 : i64, scratch_operands = 0 : i64, tpu.core_type = #tpu.core_type<tc>, window_params = [{transform_indices = @transform_0, window_bounds = array<i64: 1, 8, 18>}, {transform_indices = @transform_1, window_bounds = array<i64: 1, 32, 8>}]} {
    %c0 = arith.constant 0 : index
    %c0_0 = arith.constant 0 : index
    %c0_1 = arith.constant 0 : index
    %0 = vector.load %arg1[%c0, %c0_0, %c0_1] : memref<1x8x18xf32, #tpu.memory_space<vmem>>, vector<1x8x18xf32>
    %1 = tpu.iota {dimensions = array<i32: 2>} : vector<1x1x18xi32>
    %2 = tpu.iota {dimensions = array<i32: 0>} : vector<8x8xi32>
    %3 = tpu.iota {dimensions = array<i32: 1>} : vector<8x8xi32>
    %4 = arith.cmpi eq, %2, %3 : vector<8x8xi32>
    %5 = arith.extui %4 : vector<8x8xi1> to vector<8x8xi32>
    %6 = arith.sitofp %5 : vector<8x8xi32> to vector<8x8xf32>
    %c0_i32 = arith.constant 0 : i32
    %7 = vector.broadcast %c0_i32 : i32 to vector<1x1x18xi32>
    %8 = arith.cmpi sge, %1, %7 : vector<1x1x18xi32>
    %c5_i32 = arith.constant 5 : i32
    %9 = vector.broadcast %c5_i32 : i32 to vector<1x1x18xi32>
    %10 = arith.cmpi slt, %1, %9 : vector<1x1x18xi32>
    %11 = arith.andi %8, %10 : vector<1x1x18xi1>
    %12 = arith.extui %11 : vector<1x1x18xi1> to vector<1x1x18xi32>
    %13 = arith.sitofp %12 : vector<1x1x18xi32> to vector<1x1x18xf32>
    %14 = vector.broadcast %13 : vector<1x1x18xf32> to vector<1x8x18xf32>
    %15 = arith.mulf %0, %14 : vector<1x8x18xf32>
    %cst = arith.constant dense<0.000000e+00> : vector<1x8xf32>
    %16 = vector.multi_reduction <add>, %15, %cst [2] : vector<1x8x18xf32> to vector<1x8xf32>
    %17 = vector.shape_cast %16 : vector<1x8xf32> to vector<1x8x1xf32>
    %cst_2 = arith.constant 2.000000e-01 : f32
    %18 = vector.broadcast %cst_2 : f32 to vector<1x8x1xf32>
    %19 = arith.mulf %17, %18 : vector<1x8x1xf32>
    %20 = vector.broadcast %19 : vector<1x8x1xf32> to vector<1x8x18xf32>
    %21 = arith.subf %0, %20 : vector<1x8x18xf32>
    %22 = vector.broadcast %13 : vector<1x1x18xf32> to vector<1x8x18xf32>
    %23 = arith.mulf %21, %22 : vector<1x8x18xf32>
    %c5_i32_3 = arith.constant 5 : i32
    %24 = vector.broadcast %c5_i32_3 : i32 to vector<1x1x18xi32>
    %25 = arith.cmpi sge, %1, %24 : vector<1x1x18xi32>
    %c10_i32 = arith.constant 10 : i32
    %26 = vector.broadcast %c10_i32 : i32 to vector<1x1x18xi32>
    %27 = arith.cmpi slt, %1, %26 : vector<1x1x18xi32>
    %28 = arith.andi %25, %27 : vector<1x1x18xi1>
    %29 = arith.extui %28 : vector<1x1x18xi1> to vector<1x1x18xi32>
    %30 = arith.sitofp %29 : vector<1x1x18xi32> to vector<1x1x18xf32>
    %31 = vector.broadcast %30 : vector<1x1x18xf32> to vector<1x8x18xf32>
    %32 = arith.mulf %0, %31 : vector<1x8x18xf32>
    %cst_4 = arith.constant dense<0.000000e+00> : vector<1x8xf32>
    %33 = vector.multi_reduction <add>, %32, %cst_4 [2] : vector<1x8x18xf32> to vector<1x8xf32>
    %34 = vector.shape_cast %33 : vector<1x8xf32> to vector<1x8x1xf32>
    %cst_5 = arith.constant 2.000000e-01 : f32
    %35 = vector.broadcast %cst_5 : f32 to vector<1x8x1xf32>
    %36 = arith.mulf %34, %35 : vector<1x8x1xf32>
    %37 = vector.broadcast %36 : vector<1x8x1xf32> to vector<1x8x18xf32>
    %38 = arith.subf %0, %37 : vector<1x8x18xf32>
    %39 = vector.broadcast %30 : vector<1x1x18xf32> to vector<1x8x18xf32>
    %40 = arith.mulf %38, %39 : vector<1x8x18xf32>
    %c10_i32_6 = arith.constant 10 : i32
    %41 = vector.broadcast %c10_i32_6 : i32 to vector<1x1x18xi32>
    %42 = arith.cmpi sge, %1, %41 : vector<1x1x18xi32>
    %c14_i32 = arith.constant 14 : i32
    %43 = vector.broadcast %c14_i32 : i32 to vector<1x1x18xi32>
    %44 = arith.cmpi slt, %1, %43 : vector<1x1x18xi32>
    %45 = arith.andi %42, %44 : vector<1x1x18xi1>
    %46 = arith.extui %45 : vector<1x1x18xi1> to vector<1x1x18xi32>
    %47 = arith.sitofp %46 : vector<1x1x18xi32> to vector<1x1x18xf32>
    %48 = vector.broadcast %47 : vector<1x1x18xf32> to vector<1x8x18xf32>
    %49 = arith.mulf %0, %48 : vector<1x8x18xf32>
    %cst_7 = arith.constant dense<0.000000e+00> : vector<1x8xf32>
    %50 = vector.multi_reduction <add>, %49, %cst_7 [2] : vector<1x8x18xf32> to vector<1x8xf32>
    %51 = vector.shape_cast %50 : vector<1x8xf32> to vector<1x8x1xf32>
    %cst_8 = arith.constant 2.500000e-01 : f32
    %52 = vector.broadcast %cst_8 : f32 to vector<1x8x1xf32>
    %53 = arith.mulf %51, %52 : vector<1x8x1xf32>
    %54 = vector.broadcast %53 : vector<1x8x1xf32> to vector<1x8x18xf32>
    %55 = arith.subf %0, %54 : vector<1x8x18xf32>
    %56 = vector.broadcast %47 : vector<1x1x18xf32> to vector<1x8x18xf32>
    %57 = arith.mulf %55, %56 : vector<1x8x18xf32>
    %c14_i32_9 = arith.constant 14 : i32
    %58 = vector.broadcast %c14_i32_9 : i32 to vector<1x1x18xi32>
    %59 = arith.cmpi sge, %1, %58 : vector<1x1x18xi32>
    %c18_i32 = arith.constant 18 : i32
    %60 = vector.broadcast %c18_i32 : i32 to vector<1x1x18xi32>
    %61 = arith.cmpi slt, %1, %60 : vector<1x1x18xi32>
    %62 = arith.andi %59, %61 : vector<1x1x18xi1>
    %63 = arith.extui %62 : vector<1x1x18xi1> to vector<1x1x18xi32>
    %64 = arith.sitofp %63 : vector<1x1x18xi32> to vector<1x1x18xf32>
    %65 = vector.broadcast %64 : vector<1x1x18xf32> to vector<1x8x18xf32>
    %66 = arith.mulf %0, %65 : vector<1x8x18xf32>
    %cst_10 = arith.constant dense<0.000000e+00> : vector<1x8xf32>
    %67 = vector.multi_reduction <add>, %66, %cst_10 [2] : vector<1x8x18xf32> to vector<1x8xf32>
    %68 = vector.shape_cast %67 : vector<1x8xf32> to vector<1x8x1xf32>
    %cst_11 = arith.constant 2.500000e-01 : f32
    %69 = vector.broadcast %cst_11 : f32 to vector<1x8x1xf32>
    %70 = arith.mulf %68, %69 : vector<1x8x1xf32>
    %71 = vector.broadcast %70 : vector<1x8x1xf32> to vector<1x8x18xf32>
    %72 = arith.subf %0, %71 : vector<1x8x18xf32>
    %73 = vector.broadcast %64 : vector<1x1x18xf32> to vector<1x8x18xf32>
    %74 = arith.mulf %72, %73 : vector<1x8x18xf32>
    %75 = vector.shape_cast %23 : vector<1x8x18xf32> to vector<8x18xf32>
    %76 = vector.shape_cast %40 : vector<1x8x18xf32> to vector<8x18xf32>
    %77 = vector.shape_cast %57 : vector<1x8x18xf32> to vector<8x18xf32>
    %78 = vector.shape_cast %74 : vector<1x8x18xf32> to vector<8x18xf32>
    %79 = tpu.concatenate %75, %76, %77, %78 in 0 : vector<8x18xf32>, vector<8x18xf32>, vector<8x18xf32>, vector<8x18xf32> -> vector<32x18xf32>
    %cst_12 = arith.constant dense<0.000000e+00> : vector<32x32xf32>
    %80 = tpu.matmul %79, %79, %cst_12 {dimension_numbers = #tpu.dot_dimension_numbers<[1], [1], [0], [0], [0, 0, 1, 0], [], []>} : vector<32x18xf32>, vector<32x18xf32>, vector<32x32xf32> -> vector<32x32xf32>
    %81 = vector.extract_strided_slice %80 {offsets = [0, 0], sizes = [8, 8], strides = [1, 1]} : vector<32x32xf32> to vector<8x8xf32>
    %cst_13 = arith.constant 2.500000e-01 : f32
    %82 = vector.broadcast %cst_13 : f32 to vector<8x8xf32>
    %83 = arith.mulf %81, %82 : vector<8x8xf32>
    %84 = arith.mulf %83, %6 : vector<8x8xf32>
    %85 = vector.shape_cast %84 : vector<8x8xf32> to vector<1x8x8xf32>
    %cst_14 = arith.constant dense<0.000000e+00> : vector<1xf32>
    %86 = vector.multi_reduction <add>, %85, %cst_14 [1, 2] : vector<1x8x8xf32> to vector<1xf32>
    %87 = vector.shape_cast %86 : vector<1xf32> to vector<1x1x1xf32>
    %88 = vector.extract %87[0, 0, 0] : f32 from vector<1x1x1xf32>
    %89 = vector.broadcast %88 : f32 to vector<8x8xf32>
    %90 = arith.divf %83, %89 : vector<8x8xf32>
    %cst_15 = arith.constant 9.99999974E-6 : f32
    %91 = vector.broadcast %cst_15 : f32 to vector<8x8xf32>
    %92 = arith.mulf %91, %6 : vector<8x8xf32>
    %93 = arith.addf %90, %92 : vector<8x8xf32>
    %94 = vector.extract_strided_slice %80 {offsets = [8, 8], sizes = [8, 8], strides = [1, 1]} : vector<32x32xf32> to vector<8x8xf32>
    %cst_16 = arith.constant 2.500000e-01 : f32
    %95 = vector.broadcast %cst_16 : f32 to vector<8x8xf32>
    %96 = arith.mulf %94, %95 : vector<8x8xf32>
    %97 = arith.mulf %96, %6 : vector<8x8xf32>
    %98 = vector.shape_cast %97 : vector<8x8xf32> to vector<1x8x8xf32>
    %cst_17 = arith.constant dense<0.000000e+00> : vector<1xf32>
    %99 = vector.multi_reduction <add>, %98, %cst_17 [1, 2] : vector<1x8x8xf32> to vector<1xf32>
    %100 = vector.shape_cast %99 : vector<1xf32> to vector<1x1x1xf32>
    %101 = vector.extract %100[0, 0, 0] : f32 from vector<1x1x1xf32>
    %102 = vector.broadcast %101 : f32 to vector<8x8xf32>
    %103 = arith.divf %96, %102 : vector<8x8xf32>
    %cst_18 = arith.constant 9.99999974E-6 : f32
    %104 = vector.broadcast %cst_18 : f32 to vector<8x8xf32>
    %105 = arith.mulf %104, %6 : vector<8x8xf32>
    %106 = arith.addf %103, %105 : vector<8x8xf32>
    %107 = vector.extract_strided_slice %80 {offsets = [16, 16], sizes = [8, 8], strides = [1, 1]} : vector<32x32xf32> to vector<8x8xf32>
    %cst_19 = arith.constant 0.333333343 : f32
    %108 = vector.broadcast %cst_19 : f32 to vector<8x8xf32>
    %109 = arith.mulf %107, %108 : vector<8x8xf32>
    %110 = arith.mulf %109, %6 : vector<8x8xf32>
    %111 = vector.shape_cast %110 : vector<8x8xf32> to vector<1x8x8xf32>
    %cst_20 = arith.constant dense<0.000000e+00> : vector<1xf32>
    %112 = vector.multi_reduction <add>, %111, %cst_20 [1, 2] : vector<1x8x8xf32> to vector<1xf32>
    %113 = vector.shape_cast %112 : vector<1xf32> to vector<1x1x1xf32>
    %114 = vector.extract %113[0, 0, 0] : f32 from vector<1x1x1xf32>
    %115 = vector.broadcast %114 : f32 to vector<8x8xf32>
    %116 = arith.divf %109, %115 : vector<8x8xf32>
    %cst_21 = arith.constant 9.99999974E-6 : f32
    %117 = vector.broadcast %cst_21 : f32 to vector<8x8xf32>
    %118 = arith.mulf %117, %6 : vector<8x8xf32>
    %119 = arith.addf %116, %118 : vector<8x8xf32>
    %120 = vector.extract_strided_slice %80 {offsets = [24, 24], sizes = [8, 8], strides = [1, 1]} : vector<32x32xf32> to vector<8x8xf32>
    %cst_22 = arith.constant 0.333333343 : f32
    %121 = vector.broadcast %cst_22 : f32 to vector<8x8xf32>
    %122 = arith.mulf %120, %121 : vector<8x8xf32>
    %123 = arith.mulf %122, %6 : vector<8x8xf32>
    %124 = vector.shape_cast %123 : vector<8x8xf32> to vector<1x8x8xf32>
    %cst_23 = arith.constant dense<0.000000e+00> : vector<1xf32>
    %125 = vector.multi_reduction <add>, %124, %cst_23 [1, 2] : vector<1x8x8xf32> to vector<1xf32>
    %126 = vector.shape_cast %125 : vector<1xf32> to vector<1x1x1xf32>
    %127 = vector.extract %126[0, 0, 0] : f32 from vector<1x1x1xf32>
    %128 = vector.broadcast %127 : f32 to vector<8x8xf32>
    %129 = arith.divf %122, %128 : vector<8x8xf32>
    %cst_24 = arith.constant 9.99999974E-6 : f32
    %130 = vector.broadcast %cst_24 : f32 to vector<8x8xf32>
    %131 = arith.mulf %130, %6 : vector<8x8xf32>
    %132 = arith.addf %129, %131 : vector<8x8xf32>
    %133 = tpu.concatenate %93, %106, %119, %132 in 0 : vector<8x8xf32>, vector<8x8xf32>, vector<8x8xf32>, vector<8x8xf32> -> vector<32x8xf32>
    %134 = vector.shape_cast %133 : vector<32x8xf32> to vector<1x32x8xf32>
    %c0_25 = arith.constant 0 : index
    %c0_26 = arith.constant 0 : index
    %c0_27 = arith.constant 0 : index
    %135 = vector.load %arg2[%c0_25, %c0_26, %c0_27] : memref<1x32x8xf32, #tpu.memory_space<vmem>>, vector<1x32x8xf32>
    tpu.vector_store %arg2[%c0_25, %c0_26, %c0_27], %134 {strides = array<i32>} : memref<1x32x8xf32, #tpu.memory_space<vmem>>, vector<1x32x8xf32>,
    return
  }
  func.func @transform_0(%arg0: i32) -> (i32, i32, i32) {
    %c0_i32 = arith.constant 0 : i32
    %c0_i32_0 = arith.constant 0 : i32
    %c0_i32_1 = arith.constant 0 : i32
    return %arg0, %c0_i32, %c0_i32_0 : i32, i32, i32
  }
  func.func @transform_1(%arg0: i32) -> (i32, i32, i32) {
    %c0_i32 = arith.constant 0 : i32
    %c0_i32_0 = arith.constant 0 : i32
    %c0_i32_1 = arith.constant 0 : i32
    return %arg0, %c0_i32, %c0_i32_0 : i32, i32, i32
  }
}

</mosaic_0001>

<bundles_post_ra>
// kernel: tpu_custom_call.1
= control target key start
LH: loop header
LB: loop body
LE: loop exit
PB: predicated region body
PF: predicated region fallthrough
CT: control target
= control target key end

     0   :  { %6 = vsyncpa [#allocation3], 0  ;;  %s840_s0 = inlined_call_operand.hbm [shape: f32[2,8,18], index: 0, kind: input, shape index: {}]   ;;  %s841_s1 = inlined_call_operand.vmem [shape: f32[2,32,8], index: 1, kind: output, shape index: {}]  }
   0x1   :  { %8 = vsyncpa [#allocation3 + $0x1], 0  ;;  %s678_s6 = smov 0   ;;  %s680_s7 = smov 0  }
   0x2   :  { %s682_s8 = smov 0   ;;  %s684_s9 = smov 0  }
   0x3 LB: > { %s697_s10 = sadd.s32 4294967295, %s658_s9   ;;  %s700_s11 = sadd.s32 1, %s658_s9   ;;  %s658_s9 = sphi %s684_s9, %s849_s9   ;;  %s654_s8 = sphi %s682_s8, %s848_s8   ;;  %s650_s7 = sphi %s680_s7, %s847_s7   ;;  %s646_s6 = sphi %s678_s6, %s846_s6  }
   0x4   : > { %s18_s12 = ssub.s32 %s658_s9, %s700_s11  ;;  %s21_s13 = sadd.s32 1, %s654_s8 }
   0x5   : > { %p19_p0 = scmp.eq.s32.totalorder %s18_s12, 0  ;;  %p28_p1 = scmp.ne.s32.totalorder %s654_s8, %s650_s7 }
   0x6   : > { %p29_p2 = scmp.eq.s32.totalorder %s658_s9, 0  ;;  %p34_p3 = scmp.ne.s32.totalorder %s650_s7, %s646_s6 }
   0x7   : > { %s710_s14 = scalar_select %p19_p0, %s654_s8, %s21_s13  }
   0x8   : > { %p30_p4 = por %p29_p2, %p28_p1  ;;  %p35_p5 = scmp.eq.s32.totalorder %s697_s10, 0 }
   0x9   : > { %p546_p6 = scmp.lt.s32.totalorder %s658_s9, 2  ;;  %s84_s16 = sand.u32 1, %s654_s8  }
   0xa   : > { %p714_p7 = por %p35_p5, %p34_p3  ;;  %s472_s17 = sshll.u32 %s84_s16, 3 }
   0xb   : > { %s473_s18 = sshll.u32 %s658_s9, 7  ;;  %s88_s22 = scalar_lea.vmem [#allocation2], %s472_s17 }
   0xc   : > { %s723_s21 = scalar_lea.hbm %s840_s0, %s473_s18  ;;  %s95_s23 = sshll.u32 %s88_s22, 4  ;;  %s725_s23 = int_to_ptr.vmem [resolvable:$true] %s95_s23 }
   0xd   : > { %p727_p8 = pnand %p546_p6, %p30_p4  ;;  %s85_s25 = scalar_lea.sflag [#allocation3], %s84_s16 }
   0xe   : > { %s594_s26 = scalar_lea.hbm %s723_s21, 128  ;;  %s599_s29 = scalar_lea.hbm %s840_s0, 256 }
   0xf   : > { %p595_p11 = scmp.ne.s32.totalorder %s723_s21, %s594_s26  ;;  %p596_p12 = pneg %p727_p8 }
  0x10   : > { %p600_p1 = scmp.lt.u32.totalorder %s723_s21, %s840_s0  ;;  %p601_p2 = scmp.lt.u32.totalorder %s599_s29, %s594_s26 }
  0x11   : > { %p597_p13 = pnand %p596_p12, %p595_p11  ;;  %p603_p4 = scmp.lt.u32.totalorder %s594_s26, %s723_s21 }
  0x12   : > { %p602_p3 = por %p601_p2, %p600_p1 }
  0x13   : > { %p598_p0 = pneg %p597_p13 }
  0x14   : > { %p604_p5 = por %p603_p4, %p602_p3 }
  0x16   : > { %p605_p6 = pnand %p604_p5, %p598_p0 }
  0x18   : > { %608 = shalt.err (!%p605_p6)
}
  0x19   : > { %s609_s3 = scalar_lea.vmem %s725_s23, 128  ;;  %s660_s4 = smov [#allocation2]  }
  0x1a   : > { %p610_p11 = scmp.ne.s32.totalorder %s725_s23, %s609_s3  ;;  %s614_s5 = sshll.u32 %s660_s4, 4  ;;  %s615_s5 = int_to_ptr.vmem [resolvable:$false] %s614_s5 }
  0x1b   : > { %s616_s6 = scalar_lea.vmem %s615_s5, 256  ;;  %p617_p10 = scmp.lt.s32.totalorder %s725_s23, %s615_s5 }
  0x1c   : > { %p612_p13 = pnand %p610_p11, %p596_p12  ;;  %p618_p1 = scmp.lt.s32.totalorder %s616_s6, %s609_s3 }
  0x1e   : > { %p613_p9 = pneg %p612_p13  ;;  %p619_p2 = por %p618_p1, %p617_p10 }
  0x20   : > { %p620_p3 = pnand %p619_p2, %p613_p9 }
  0x22   : > { %623 = shalt.err (!%p620_p3)
}
  0x23   : > { %545 = dma.hbm_to_vmem [thread:$0]  (!%p727_p8), %s723_s21, 128, %s725_s23, %s85_s25  }
  0x24   : > { %p844_p0 = scmp.lt.s32.totalorder %s658_s9, 3  ;;  %p845_p4 = scmp.ge.s32.totalorder %s658_s9, 1 }
  0x26   : > { %p101_p12 = pnand %p845_p4, %p844_p0 }
  0x27   : > { %s106_s12 = sand.u32 (!%p101_p12), 1, %s650_s7  }
  0x28   : > { %104 = sbr.rel (%p101_p12) target bundleno = 900 (0x384), region = 24  ;;  %s475_s13 = sshll.u32 (!%p101_p12), %s106_s12, 3 }
  0x29   : > { %s107_s16 = scalar_lea.sflag (!%p101_p12), [#allocation3], %s106_s12  ;;  %s110_s17 = scalar_lea.vmem (!%p101_p12), [#allocation2], %s475_s13 }
  0x2f   : > { %641 = dma.done.wait (%p714_p7), %s107_s16, 128  }
  0x30   : > { %643 = vsyncadd (%p714_p7), %s107_s16, 4294967168  ;;  %v135_v0 = vlaneseq  ;;  %v661_v2 = vmov 0.0   ;;  %v134_v5 = vld [vmem:[%s110_s17] sm:$0xff]  ;;  %vm148_vm9 = vcmask 146432   ;;  %s662_s9 = smov 16   ;;  %s663_s15 = smov 8  }
  0x31   : > { %s664_s18 = smov 24   ;;  %vm517_vm12 = vmpackc.low %vm148_vm9, %vm148_vm9  ;;  %s665_s19 = smov 120   ;;  %vm290_vm13 = vcmask 64512  }
  0x32   : > { %v136_v1 = vand.u32 127, %v135_v0  ;;  %v138_v16 = vshrl.u32 %v135_v0, 7  ;;  %s666_s20 = smov 112   ;;  %s667_s21 = smov 104  }
  0x33   : > { %p129_p7 = scmp.lt.s32.totalorder %s697_s10, 1 }
  0x34   : > { %vm143_vm0 = vcmp.lt.s32.totalorder %v136_v1, 5  ;;  %vm167_vm1 = vcmp.ge.s32.totalorder %v136_v1, 10  ;;  %vm168_vm2 = vcmp.lt.s32.totalorder %v136_v1, 14  ;;  %vm155_vm3 = vcmp.ge.s32.totalorder %v136_v1, 5 }
  0x35   : > { %v479_v3 = vsel %vm143_vm0, 1.0, %v661_v2  ;;  %vm169_vm4 = vmand %vm167_vm1, %vm168_vm2  ;;  %vm156_vm5 = vcmp.lt.s32.totalorder %v136_v1, 10  ;;  %vm179_vm6 = vcmp.ge.s32.totalorder %v136_v1, 14  ;;  %vm180_vm7 = vcmp.lt.s32.totalorder %v136_v1, 18  ;;  %s851_s10 = smov (!%p129_p7, %s697_s10), 1 }
  0x36   : > { %v481_v4 = vsel %vm169_vm4, 1.0, %v661_v2  ;;  %vm157_vm8 = vmand %vm155_vm3, %vm156_vm5  ;;  %v147_v7 = vmul.f32 %v479_v3, %v134_v5  ;;  %vm139_vm11 = vcmp.eq.s32.totalorder %v138_v16, %v136_v1  ;;  %s493_s23 = sshll.u32 %s851_s10, 5 }
  0x37   : > { %v480_v6 = vsel %vm157_vm8, 1.0, %v661_v2  ;;  %vm181_vm10 = vmand %vm179_vm6, %vm180_vm7  ;;  %v172_v8 = vmul.f32 %v481_v4, %v134_v5  ;;  %v771_v17 = vsel %vm139_vm11, 1.0, %v661_v2  ;;  %s811_s26 = scalar_lea.vmem %s841_s1, %s493_s23 }
  0x38   : > { %v160_v9 = vmul.f32 %v480_v6, %v134_v5  ;;  %v482_v10 = vsel %vm181_vm10, 1.0, %v661_v2  ;;  %v149_v12 = vsel %vm148_vm9, %v147_v7, 0.0  ;;  %v304_v58 = vmul.f32 1e-05, %v771_v17 }
  0x39   : > { %v184_v11 = vmul.f32 %v482_v10, %v134_v5  ;;  %v173_v13 = vsel %vm148_vm9, %v172_v8, 0.0  ;;  %150 = vadd.xlane.f32.xlu0 %v149_v12 }
  0x3a   : > { %174 = vadd.xlane.f32.xlu1 %v173_v13  ;;  %v161_v14 = vsel %vm148_vm9, %v160_v9, 0.0 }
  0x3b   : > { %v185_v15 = vsel %vm148_vm9, %v184_v11, 0.0 }
  0x3d   : > { %162 = vadd.xlane.f32.xlu0 %v161_v14 }
  0x3e   : > { %186 = vadd.xlane.f32.xlu1 %v185_v15 }
  0x4f   : > { %335 = vrot.lane.b32.xlu1 %v771_v17, %s662_s9 }
  0x53   : > { %308 = vrot.lane.b32.xlu0 %v771_v17, %s663_s15  ;;  %361 = vrot.lane.b32.xlu1 %v771_v17, %s664_s18 }
  0xc6   : > { %v151_v18 = vpop.xlane.xlu0 %150 }
  0xc7   : > { %v175_v19 = vpop.xlane.xlu1 %174  ;;  %v152_v20 = vmul.f32 0.2, %v151_v18 }
  0xc8   : > { %v176_v21 = vmul.f32 0.25, %v175_v19 }
  0xc9   : > { %v153_v22 = vsub.f32 %v134_v5, %v152_v20 }
  0xca   : > { %v177_v23 = vsub.f32 %v134_v5, %v176_v21  ;;  %v163_v24 = vpop.xlane.xlu0 %162 }
  0xcb   : > { %v187_v25 = vpop.xlane.xlu1 %186  ;;  %v164_v26 = vmul.f32 0.2, %v163_v24  ;;  %v154_v27 = vmul.f32 %v479_v3, %v153_v22 }
  0xcc   : > { %v188_v28 = vmul.f32 0.25, %v187_v25  ;;  %v178_v29 = vmul.f32 %v481_v4, %v177_v23 }
  0xcd   : > { %v165_v30 = vsub.f32 %v134_v5, %v164_v26  ;;  %510 = vmatprep.mubr.msk.f32.mxu0 %vm148_vm9, %v154_v27 }
  0xce   : > { %v189_v31 = vsub.f32 %v134_v5, %v188_v28  ;;  %513 = vmatprep.mubr.msk.f32.mxu1 %vm148_vm9, %v178_v29  ;;  %v309_v37 = vpop.permute.xlu0 %308 }
  0xcf   : > { %v166_v32 = vmul.f32 %v480_v6, %v165_v30  ;;  %v336_v36 = vpop.permute.xlu1 %335 }
  0xd0   : > { %v190_v33 = vmul.f32 %v482_v10, %v189_v31 }
  0xd1   : > { %v516_v34 = vpack.c.bf16 %v166_v32, %v154_v27 }
  0xd2   : > { %v522_v35 = vpack.c.bf16 %v190_v33, %v178_v29 }
  0xd3   : > { %518 = vmatprep.subr.msk.bf16.mxu0 %vm517_vm12, %v516_v34  ;;  %528 = vmatprep.subr.msk.bf16.mxu1 %vm517_vm12, %v516_v34  ;;  %v362_v47 = vpop.permute.xlu1 %361 }
  0xd4   : > { %521 = vmatpush3.bf16.xpose.msk.msra.mxu0 %vm517_vm12, %v516_v34  ;;  %530 = vmatpush3.bf16.xpose.msk.msra.mxu1 %vm517_vm12, %v516_v34 }
  0xd5   : > { %524 = vmatprep.subr.msk.bf16.mxu0 %vm517_vm12, %v522_v35  ;;  %529 = vmatprep.subr.msk.bf16.mxu1 %vm517_vm12, %v522_v35 }
  0xdc   : > { %527 = vmatpush3.bf16.xpose.msk.msra.mxu0 %vm517_vm12, %v522_v35  ;;  %531 = vmatpush3.bf16.xpose.msk.msra.mxu1 %vm517_vm12, %v522_v35 }
  0xe3   : > { %511 = vmatmul.mubr.msk.f32.vlgmr.msra.gmra.mrb[0].mxu0 %vm148_vm9, %v166_v32  ;;  %514 = vmatmul.mubr.msk.f32.vlgmr.msra.gmra.mrb[0].mxu1 %vm148_vm9, %v190_v33 }
 0x1b6   : > { %v512_v38 = vpop.f32.mrb[0].mxu0  ;;  %v515_v39 = vpop.f32.mrb[0].mxu1 }
 0x1b7   : > { %v785_v40 = vmul.f32 0.25, %v512_v38  ;;  %v269_v41 = vpop.f32.mrb[1].mxu0  ;;  %v279_v42 = vpop.f32.mrb[1].mxu1  ;;  %v789_v44 = vmul.f32 0.33333334, %v515_v39 }
 0x1b8   : > { %v787_v43 = vmul.f32 0.33333334, %v279_v42  ;;  %v288_v49 = vmul.f32 0.25, %v269_v41 }
 0x1b9   : > { %v311_v45 = vmul.f32 %v309_v37, %v785_v40  ;;  %v364_v48 = vmul.f32 %v362_v47, %v789_v44 }
 0x1ba   : > { %v338_v46 = vmul.f32 %v336_v36, %v787_v43  ;;  %v289_v50 = vmul.f32 %v771_v17, %v288_v49 }
 0x1bb   : > { %313 = vrot.lane.b32.xlu1 %v311_v45, %s665_s19 }
 0x1bc   : > { %340 = vrot.lane.b32.xlu0 %v338_v46, %s666_s20  ;;  %v291_v51 = vsel %vm290_vm13, %v289_v50, 0.0 }
 0x1bf   : > { %366 = vrot.lane.b32.xlu1 %v364_v48, %s667_s21 }
 0x1db   : > { %292 = vadd.xlane.f32.xlu0 %v291_v51 }
 0x22d   : > { %v314_v52 = vpop.permute.xlu1 %313 }
 0x22e   : > { %v341_v53 = vpop.permute.xlu0 %340  ;;  %v316_v54 = vsel %vm290_vm13, %v314_v52, 0.0 }
 0x22f   : > { %317 = vadd.xlane.f32.xlu1 %v316_v54  ;;  %v343_v55 = vsel %vm290_vm13, %v341_v53, 0.0 }
 0x230   : > { %344 = vadd.xlane.f32.xlu0 %v343_v55 }
 0x231   : > { %v367_v56 = vpop.permute.xlu1 %366 }
 0x232   : > { %v369_v57 = vsel %vm290_vm13, %v367_v56, 0.0 }
 0x234   : > { %370 = vadd.xlane.f32.xlu0 %v369_v57 }
 0x240   : > { %356 = vrot.lane.b32.xlu1 %v304_v58, %s662_s9 }
 0x244   : > { %382 = vrot.lane.b32.xlu1 %v304_v58, %s664_s18 }
 0x24a   : > { %330 = vrot.lane.b32.xlu0 %v304_v58, %s663_s15 }
 0x268   : > { %v293_v59 = vpop.xlane.xlu0 %292 }
 0x269   : > { %v294_v60 = vrot.slane %v293_v59, 4 }
 0x26b   : > { %v295_v61 = vadd.f32 %v294_v60, %v293_v59 }
 0x26d   : > { %v296_v62 = vrot.slane %v295_v61, 2 }
 0x26f   : > { %v297_v63 = vadd.f32 %v296_v62, %v295_v61 }
 0x271   : > { %v298_v0 = vrot.slane %v297_v63, 1 }
 0x273   : > { %v299_v1 = vadd.f32 %v298_v0, %v297_v63 }
 0x275   : > { %532 = vpush %v299_v1 }
 0x2a6   : > { %s533_s22 = spop %532 }
 0x2a7   : > { %v301_v2 = vstv %s533_s22 }
 0x2a8   : > { %586 = vrcp.f32 %v301_v2 }
 0x2b2   : > { %v587_v3 = vpop.eup %586 }
 0x2b3   : > { %v303_v4 = vmul.f32 %v587_v3, %v288_v49 }
 0x2b5   : > { %v305_v5 = vadd.f32 %v304_v58, %v303_v4 }
 0x2b7   : > { %398 = vst.msk [vmem:[%s811_s26] sm:$0xff] %vm290_vm13, %v305_v5 }
 0x2bc   : > { %v318_v6 = vpop.xlane.xlu1 %317 }
 0x2bd   : > { %v319_v7 = vrot.slane %v318_v6, 4  ;;  %v345_v8 = vpop.xlane.xlu0 %344 }
 0x2be   : > { %v346_v9 = vrot.slane %v345_v8, 4 }
 0x2bf   : > { %v320_v10 = vadd.f32 %v319_v7, %v318_v6 }
 0x2c0   : > { %v347_v11 = vadd.f32 %v346_v9, %v345_v8  ;;  %v357_v30 = vpop.permute.xlu1 %356 }
 0x2c1   : > { %v321_v12 = vrot.slane %v320_v10, 2  ;;  %v371_v13 = vpop.xlane.xlu0 %370 }
 0x2c2   : > { %v348_v14 = vrot.slane %v347_v11, 2  ;;  %v372_v15 = vrot.slane %v371_v13, 4 }
 0x2c3   : > { %v322_v16 = vadd.f32 %v321_v12, %v320_v10 }
 0x2c4   : > { %v373_v17 = vadd.f32 %v372_v15, %v371_v13  ;;  %v349_v18 = vadd.f32 %v348_v14, %v347_v11  ;;  %v383_v39 = vpop.permute.xlu1 %382 }
 0x2c5   : > { %v323_v19 = vrot.slane %v322_v16, 1  ;;  %v331_v32 = vpop.permute.xlu0 %330 }
 0x2c6   : > { %v374_v20 = vrot.slane %v373_v17, 2  ;;  %v350_v21 = vrot.slane %v349_v18, 1 }
 0x2c7   : > { %v324_v22 = vadd.f32 %v323_v19, %v322_v16 }
 0x2c8   : > { %v351_v23 = vadd.f32 %v350_v21, %v349_v18  ;;  %v375_v24 = vadd.f32 %v374_v20, %v373_v17 }
 0x2c9   : > { %534 = vpush %v324_v22 }
 0x2ca   : > { %536 = vpush %v351_v23  ;;  %v376_v25 = vrot.slane %v375_v24, 1 }
 0x2cc   : > { %v377_v26 = vadd.f32 %v376_v25, %v375_v24 }
 0x2ce   : > { %538 = vpush %v377_v26 }
 0x2fa   : > { %s535_s10 = spop %534 }
 0x2fb   : > { %v326_v27 = vstv %s535_s10  ;;  %s537_s27 = spop %536 }
 0x2fc   : > { %588 = vrcp.f32 %v326_v27  ;;  %v353_v28 = vstv %s537_s27 }
 0x2fd   : > { %590 = vrcp.f32 %v353_v28 }
 0x2ff   : > { %s539_s28 = spop %538 }
 0x300   : > { %v379_v29 = vstv %s539_s28 }
 0x301   : > { %592 = vrcp.f32 %v379_v29 }
 0x306   : > { %v589_v31 = vpop.eup %588 }
 0x307   : > { %v591_v33 = vpop.eup %590  ;;  %v328_v34 = vmul.f32 %v589_v31, %v785_v40 }
 0x308   : > { %v355_v35 = vmul.f32 %v591_v33, %v787_v43 }
 0x309   : > { %v333_v36 = vadd.f32 %v331_v32, %v328_v34 }
 0x30a   : > { %v359_v37 = vadd.f32 %v357_v30, %v355_v35 }
 0x30b   : > { %v593_v38 = vpop.eup %592  ;;  %387 = vrot.lane.b32.xlu1 %v333_v36, %s665_s19 }
 0x30c   : > { %391 = vrot.lane.b32.xlu0 %v359_v37, %s666_s20  ;;  %v381_v41 = vmul.f32 %v593_v38, %v789_v44 }
 0x30e   : > { %v385_v42 = vadd.f32 %v383_v39, %v381_v41 }
 0x310   : > { %395 = vrot.lane.b32.xlu1 %v385_v42, %s667_s21 }
 0x37d   : > { %v388_v45 = vpop.permute.xlu1 %387 }
 0x37e   : > { %399 = vst.msk [vmem:[%s811_s26 + $0x8] sm:$0xff] %vm290_vm13, %v388_v45  ;;  %v392_v40 = vpop.permute.xlu0 %391 }
 0x37f   : > { %400 = vst.msk [vmem:[%s811_s26 + $0x10] sm:$0xff] %vm290_vm13, %v392_v40 }
 0x382   : > { %v396_v43 = vpop.permute.xlu1 %395 }
 0x383   : > { %401 = vst.msk [vmem:[%s811_s26 + $0x18] sm:$0xff] %vm290_vm13, %v396_v43 }
 0x384 PF: > { %p11_p8 = scmp.ge.s32.totalorder %s700_s11, 4   ;;  %s846_s6 = smov %s650_s7 }
 0x385   : > { %s847_s7 = smov %s654_s8  ;;  %s848_s8 = smov %s710_s14 }
 0x386   : > { %s849_s9 = smov %s700_s11  ;;  %13 = sbr.rel (!%p11_p8) target bundleno = 3 (0x3), region = 64 }
 0x38d   :  { %423 = vsyncpa [#allocation3], 1 }
 0x38e   :  { %425 = vsyncpa [#allocation3 + $0x1], 1 }

</bundles_post_ra>
